<compile_context>
chip_gen: v7x
topology: tpu7x:2x2x1
jax: 0.10.0
libtpu: 0.0.40
codegen_flags: <defaults>
</compile_context>

<pallas_src>
import jax
import jax.numpy as jnp
import numpy as np
from jax.experimental import pallas as pl
from jax.experimental.pallas import tpu as pltpu

SMOOTH = 1e-6
_LANES = 128
_SUBLANES = 8
_NUM_CORES = 2          # leading 'parallel' grid axis (used by v7x; harmless on 1-TC chips)
_MAX_BLOCK_ROWS = 2048  # (2048, 128) f32 block = 1 MiB per input per pipeline buffer


def _dice_kernel(pred_ref, targ_ref, out_ref):
    """Accumulates [sum(p*t), sum(p), sum(t)] into a (1, 3, 8, 128) block."""
    s = pl.program_id(1)

    @pl.when(s == 0)
    def _init():
        out_ref[...] = jnp.zeros_like(out_ref)

    x = pred_ref[...]          # (TR, 128) logits, f32
    t = targ_ref[...]          # (TR, 128) labels, f32
    p = jax.nn.sigmoid(x)

    tr = x.shape[0]

    def fold(v):               # (TR, 128) -> (8, 128): VPU adds only, no XLU
        return v.reshape(tr // _SUBLANES, _SUBLANES, _LANES).sum(axis=0)

    out_ref[0, 0, :, :] += fold(p * t)
    out_ref[0, 1, :, :] += fold(p)
    out_ref[0, 2, :, :] += fold(t)


def _round_up(x, m):
    return ((x + m - 1) // m) * m


def dice_loss(pred, target, smooth=SMOOTH):
    """pred, target: same-shape float arrays (e.g. NCHW logits / labels)."""
    total = int(np.prod(pred.shape))

    rows = _round_up((total + _LANES - 1) // _LANES, _SUBLANES)
    tr = min(_MAX_BLOCK_ROWS,
             _round_up((rows + _NUM_CORES - 1) // _NUM_CORES, _SUBLANES))
    rows_p = _round_up(rows, _NUM_CORES * tr)
    steps = rows_p // (_NUM_CORES * tr)
    pad = rows_p * _LANES - total

    # Pad logits with a huge negative (sigmoid -> 0) and labels with 0 so the
    # padding contributes nothing to any of the three sums.
    pred_flat = jnp.pad(pred.reshape(-1).astype(jnp.float32), (0, pad),
                        constant_values=-1e9).reshape(rows_p, _LANES)
    targ_flat = jnp.pad(target.reshape(-1).astype(jnp.float32), (0, pad),
                        constant_values=0.0).reshape(rows_p, _LANES)

    partials = pl.pallas_call(
        _dice_kernel,
        out_shape=jax.ShapeDtypeStruct((_NUM_CORES, 3, _SUBLANES, _LANES),
                                       jnp.float32),
        grid_spec=pltpu.PrefetchScalarGridSpec(
            num_scalar_prefetch=0,
            grid=(_NUM_CORES, steps),
            in_specs=[
                pl.BlockSpec((tr, _LANES), lambda c, s: (c * steps + s, 0)),
                pl.BlockSpec((tr, _LANES), lambda c, s: (c * steps + s, 0)),
            ],
            out_specs=pl.BlockSpec((1, 3, _SUBLANES, _LANES),
                                   lambda c, s: (c, 0, 0, 0)),
        ),
        compiler_params=pltpu.CompilerParams(
            dimension_semantics=("parallel", "arbitrary")),
    )(pred_flat, targ_flat)

    # Per-core partial vreg accumulators -> 3 scalars -> dice (trivial flops).
    sums = jnp.sum(partials, axis=(0, 2, 3))        # (3,)
    inter, p_sum, t_sum = sums[0], sums[1], sums[2]
    dice = (2.0 * inter + smooth) / (p_sum + t_sum + smooth)
    return 1.0 - dice


def _reference(pred, target, smooth=SMOOTH):
    """Pure-JAX reference matching the PyTorch DiceLoss forward."""
    p = jax.nn.sigmoid(pred.astype(jnp.float32)).reshape(-1)
    t = target.astype(jnp.float32).reshape(-1)
    inter = jnp.sum(p * t)
    return 1.0 - (2.0 * inter + smooth) / (jnp.sum(p) + jnp.sum(t) + smooth)


if __name__ == "__main__":
    key = jax.random.PRNGKey(0)
    kp, kt = jax.random.split(key)
    B, C, H, W = 2, 4, 16, 16
    pred = jax.random.normal(kp, (B, C, H, W), dtype=jnp.float32)
    target = jax.random.bernoulli(kt, 0.3, (B, C, H, W)).astype(jnp.float32)

    loss = jax.block_until_ready(dice_loss(pred, target))
    ref = jax.block_until_ready(_reference(pred, target))
    np.testing.assert_allclose(np.asarray(loss), np.asarray(ref),
                               rtol=1e-4, atol=1e-6)
    print("KERNEL_OK")
</pallas_src>

<mosaic_0001>
module attributes {stable_mosaic.version = 11 : i64} {
  func.func @_dice_kernel(%arg0: i32, %arg1: i32, %arg2: memref<8x128xf32, #tpu.memory_space<vmem>>, %arg3: memref<8x128xf32, #tpu.memory_space<vmem>>, %arg4: memref<1x3x8x128xf32, #tpu.memory_space<vmem>>) attributes {dimension_semantics = [#tpu.dimension_semantics<parallel>, #tpu.dimension_semantics<arbitrary>], iteration_bounds = array<i64: 2, 1>, scalar_prefetch = 0 : i64, scratch_operands = 0 : i64, tpu.core_type = #tpu.core_type<tc>, window_params = [{transform_indices = @transform_0, window_bounds = array<i64: 8, 128>}, {transform_indices = @transform_1, window_bounds = array<i64: 8, 128>}, {transform_indices = @transform_2, window_bounds = array<i64: 1, 3, 8, 128>}]} {
    %c0_i32 = arith.constant 0 : i32
    %0 = arith.cmpi eq, %arg1, %c0_i32 : i32
    %1 = arith.extui %0 : i1 to i32
    %c0_i32_0 = arith.constant 0 : i32
    %2 = arith.cmpi ne, %1, %c0_i32_0 : i32
    scf.if %2 {
      %cst_29 = arith.constant 0.000000e+00 : f32
      %35 = vector.broadcast %cst_29 : f32 to vector<1x3x8x128xf32>
      %c0_30 = arith.constant 0 : index
      %c0_31 = arith.constant 0 : index
      %c0_32 = arith.constant 0 : index
      %c0_33 = arith.constant 0 : index
      %36 = vector.load %arg4[%c0_30, %c0_31, %c0_32, %c0_33] : memref<1x3x8x128xf32, #tpu.memory_space<vmem>>, vector<1x3x8x128xf32>
      tpu.vector_store %arg4[%c0_30, %c0_31, %c0_32, %c0_33], %35 {strides = array<i32>} : memref<1x3x8x128xf32, #tpu.memory_space<vmem>>, vector<1x3x8x128xf32>,
    } else {
    }
    %c0 = arith.constant 0 : index
    %c0_1 = arith.constant 0 : index
    %3 = vector.load %arg2[%c0, %c0_1] : memref<8x128xf32, #tpu.memory_space<vmem>>, vector<8x128xf32>
    %c0_2 = arith.constant 0 : index
    %c0_3 = arith.constant 0 : index
    %4 = vector.load %arg3[%c0_2, %c0_3] : memref<8x128xf32, #tpu.memory_space<vmem>>, vector<8x128xf32>
    %5 = arith.negf %3 : vector<8x128xf32>
    %6 = math.exp %5 : vector<8x128xf32>
    %cst = arith.constant 1.000000e+00 : f32
    %7 = vector.broadcast %cst : f32 to vector<8x128xf32>
    %8 = arith.addf %7, %6 : vector<8x128xf32>
    %9 = arith.divf %7, %8 : vector<8x128xf32>
    %c0_4 = arith.constant 0 : index
    %c0_5 = arith.constant 0 : index
    %c0_6 = arith.constant 0 : index
    %c0_7 = arith.constant 0 : index
    %10 = vector.load %arg4[%c0_4, %c0_5, %c0_6, %c0_7] : memref<1x3x8x128xf32, #tpu.memory_space<vmem>>, vector<1x1x8x128xf32>
    %11 = vector.shape_cast %10 : vector<1x1x8x128xf32> to vector<8x128xf32>
    %12 = arith.mulf %9, %4 : vector<8x128xf32>
    %13 = vector.shape_cast %12 : vector<8x128xf32> to vector<1x8x128xf32>
    %cst_8 = arith.constant dense<0.000000e+00> : vector<8x128xf32>
    %14 = vector.multi_reduction <add>, %13, %cst_8 [0] : vector<1x8x128xf32> to vector<8x128xf32>
    %15 = arith.addf %11, %14 : vector<8x128xf32>
    %c0_9 = arith.constant 0 : index
    %c0_10 = arith.constant 0 : index
    %c0_11 = arith.constant 0 : index
    %c0_12 = arith.constant 0 : index
    %16 = vector.load %arg4[%c0_9, %c0_10, %c0_11, %c0_12] : memref<1x3x8x128xf32, #tpu.memory_space<vmem>>, vector<1x1x8x128xf32>
    %17 = vector.shape_cast %16 : vector<1x1x8x128xf32> to vector<8x128xf32>
    %18 = vector.shape_cast %15 : vector<8x128xf32> to vector<1x1x8x128xf32>
    tpu.vector_store %arg4[%c0_9, %c0_10, %c0_11, %c0_12], %18 {strides = array<i32>} : memref<1x3x8x128xf32, #tpu.memory_space<vmem>>, vector<1x1x8x128xf32>,
    %c0_13 = arith.constant 0 : index
    %c1 = arith.constant 1 : index
    %c0_14 = arith.constant 0 : index
    %c0_15 = arith.constant 0 : index
    %19 = vector.load %arg4[%c0_13, %c1, %c0_14, %c0_15] : memref<1x3x8x128xf32, #tpu.memory_space<vmem>>, vector<1x1x8x128xf32>
    %20 = vector.shape_cast %19 : vector<1x1x8x128xf32> to vector<8x128xf32>
    %21 = vector.shape_cast %9 : vector<8x128xf32> to vector<1x8x128xf32>
    %cst_16 = arith.constant dense<0.000000e+00> : vector<8x128xf32>
    %22 = vector.multi_reduction <add>, %21, %cst_16 [0] : vector<1x8x128xf32> to vector<8x128xf32>
    %23 = arith.addf %20, %22 : vector<8x128xf32>
    %c0_17 = arith.constant 0 : index
    %c1_18 = arith.constant 1 : index
    %c0_19 = arith.constant 0 : index
    %c0_20 = arith.constant 0 : index
    %24 = vector.load %arg4[%c0_17, %c1_18, %c0_19, %c0_20] : memref<1x3x8x128xf32, #tpu.memory_space<vmem>>, vector<1x1x8x128xf32>
    %25 = vector.shape_cast %24 : vector<1x1x8x128xf32> to vector<8x128xf32>
    %26 = vector.shape_cast %23 : vector<8x128xf32> to vector<1x1x8x128xf32>
    tpu.vector_store %arg4[%c0_17, %c1_18, %c0_19, %c0_20], %26 {strides = array<i32>} : memref<1x3x8x128xf32, #tpu.memory_space<vmem>>, vector<1x1x8x128xf32>,
    %c0_21 = arith.constant 0 : index
    %c2 = arith.constant 2 : index
    %c0_22 = arith.constant 0 : index
    %c0_23 = arith.constant 0 : index
    %27 = vector.load %arg4[%c0_21, %c2, %c0_22, %c0_23] : memref<1x3x8x128xf32, #tpu.memory_space<vmem>>, vector<1x1x8x128xf32>
    %28 = vector.shape_cast %27 : vector<1x1x8x128xf32> to vector<8x128xf32>
    %29 = vector.shape_cast %4 : vector<8x128xf32> to vector<1x8x128xf32>
    %cst_24 = arith.constant dense<0.000000e+00> : vector<8x128xf32>
    %30 = vector.multi_reduction <add>, %29, %cst_24 [0] : vector<1x8x128xf32> to vector<8x128xf32>
    %31 = arith.addf %28, %30 : vector<8x128xf32>
    %c0_25 = arith.constant 0 : index
    %c2_26 = arith.constant 2 : index
    %c0_27 = arith.constant 0 : index
    %c0_28 = arith.constant 0 : index
    %32 = vector.load %arg4[%c0_25, %c2_26, %c0_27, %c0_28] : memref<1x3x8x128xf32, #tpu.memory_space<vmem>>, vector<1x1x8x128xf32>
    %33 = vector.shape_cast %32 : vector<1x1x8x128xf32> to vector<8x128xf32>
    %34 = vector.shape_cast %31 : vector<8x128xf32> to vector<1x1x8x128xf32>
    tpu.vector_store %arg4[%c0_25, %c2_26, %c0_27, %c0_28], %34 {strides = array<i32>} : memref<1x3x8x128xf32, #tpu.memory_space<vmem>>, vector<1x1x8x128xf32>,
    return
  }
  func.func @transform_0(%arg0: i32, %arg1: i32) -> (i32, i32) {
    %c1_i32 = arith.constant 1 : i32
    %0 = arith.muli %arg0, %c1_i32 : i32
    %1 = arith.addi %0, %arg1 : i32
    %c0_i32 = arith.constant 0 : i32
    %c0_i32_0 = arith.constant 0 : i32
    return %1, %c0_i32 : i32, i32
  }
  func.func @transform_1(%arg0: i32, %arg1: i32) -> (i32, i32) {
    %c1_i32 = arith.constant 1 : i32
    %0 = arith.muli %arg0, %c1_i32 : i32
    %1 = arith.addi %0, %arg1 : i32
    %c0_i32 = arith.constant 0 : i32
    %c0_i32_0 = arith.constant 0 : i32
    return %1, %c0_i32 : i32, i32
  }
  func.func @transform_2(%arg0: i32, %arg1: i32) -> (i32, i32, i32, i32) {
    %c0_i32 = arith.constant 0 : i32
    %c0_i32_0 = arith.constant 0 : i32
    %c0_i32_1 = arith.constant 0 : i32
    %c0_i32_2 = arith.constant 0 : i32
    return %arg0, %c0_i32, %c0_i32_0, %c0_i32_1 : i32, i32, i32, i32
  }
}

</mosaic_0001>

<bundles_post_ra>
// kernel: tpu_custom_call.1
= control target key start
LH: loop header
LB: loop body
LE: loop exit
PB: predicated region body
PF: predicated region fallthrough
CT: control target
= control target key end

     0   :  { %7 = vsyncpa [#allocation3], 0  ;;  %s852_s0 = inlined_call_operand.hbm [shape: f32[16,128], index: 0, kind: input, shape index: {}]   ;;  %s853_s1 = inlined_call_operand.hbm [shape: f32[16,128], index: 1, kind: input, shape index: {}]   ;;  %s854_s2 = inlined_call_operand.hbm [shape: f32[2,3,8,128], index: 2, kind: output, shape index: {}]  }
   0x1   :  { %9 = vsyncpa [#allocation3 + $0x1], 0 }
   0x2   :  { %10 = vsyncpa [#allocation6], 0 }
   0x3   :  { %12 = vsyncpa [#allocation6 + $0x1], 0 }
   0x4   :  { %13 = vsyncpa [#allocation4], 0 }
   0x5   :  { %15 = vsyncpa [#allocation4 + $0x1], 0  ;;  %s629_s9 = smov 0   ;;  %s631_s10 = smov 0  }
   0x6   :  { %s633_s11 = smov 0   ;;  %s635_s12 = smov 0  }
   0x7   :  { %s637_s13 = smov 0   ;;  %s639_s14 = smov 0  }
   0x8 LB: > { %s366_s15 = sadd.s32 4294967295, %s607_s14   ;;  %s367_s16 = sadd.s32 4294967294, %s607_s14   ;;  %s607_s14 = sphi %s639_s14, %s21_s14   ;;  %s603_s13 = sphi %s637_s13, %s874_s13   ;;  %s599_s12 = sphi %s635_s12, %s873_s12   ;;  %s595_s11 = sphi %s633_s11, %s872_s11   ;;  %s591_s10 = sphi %s631_s10, %s871_s10   ;;  %s587_s9 = sphi %s629_s9, %s870_s9  }
   0x9   : > { %s33_s17 = sadd.s32 1, %s603_s13  ;;  %s42_s18 = sadd.s32 1, %s595_s11 }
   0xa   : > { %p35_p0 = scmp.ge.s32.totalorder %s33_s17, 2  ;;  %p49_p1 = scmp.ne.s32.totalorder %s595_s11, %s591_s10 }
   0xb   : > { %p50_p2 = scmp.eq.s32.totalorder %s607_s14, 0  ;;  %p55_p3 = scmp.ne.s32.totalorder %s591_s10, %s587_s9 }
   0xc   : > { %s876_s17 = smov (%p35_p0, %s33_s17), 0  ;;  %p56_p5 = scmp.eq.s32.totalorder %s366_s15, 0 }
   0xd   : > { %p670_p4 = por %p50_p2, %p49_p1  ;;  %s39_s20 = ssub.s32 %s603_s13, %s876_s17 }
   0xe   : > { %p107_p6 = scmp.eq.s32.totalorder %s366_s15, 1  ;;  %p40_p7 = scmp.eq.s32.totalorder %s39_s20, 0 }
   0xf   : > { %p676_p8 = por %p56_p5, %p55_p3  ;;  %p113_p10 = scmp.eq.s32.totalorder %s367_s16, 1 }
  0x10   : > { %p680_p9 = por %p107_p6, %p49_p1  ;;  %p404_p13 = scmp.lt.s32.totalorder %s607_s14, 2 }
  0x11   : > { %s858_s21 = scalar_select %p676_p8, 1, 0 }
  0x12   : > { %s859_s22 = scalar_select %p680_p9, 1, 0 }
  0x13   : > { %s685_s23 = scalar_select %p40_p7, %s595_s11, %s42_s18  }
  0x14   : > { %p687_p11 = por %p113_p10, %p55_p3  ;;  %s694_s25 = sand.u32 1, %s595_s11  }
  0x15   : > { %s370_s26 = sshll.u32 %s694_s25, 3  ;;  %s371_s27 = sshll.u32 %s603_s13, 7 }
  0x16   : > { %s860_s24 = scalar_select %p687_p11, 1, 0 }
  0x17   : > { %s703_s30 = scalar_lea.hbm %s852_s0, %s371_s27  ;;  %s137_s3 = scalar_lea.vmem [#allocation2], %s370_s26 }
  0x18   : > { %s145_s4 = sshll.u32 %s137_s3, 4  ;;  %p711_p0 = pnand %p404_p13, %p670_p4  ;;  %s707_s4 = int_to_ptr.vmem [resolvable:$true] %s145_s4 }
  0x19   : > { %s134_s6 = scalar_lea.sflag [#allocation3], %s694_s25  ;;  %s461_s7 = scalar_lea.hbm %s703_s30, 128 }
  0x1a   : > { %p462_p3 = scmp.ne.s32.totalorder %s703_s30, %s461_s7  ;;  %p463_p5 = pneg %p711_p0 }
  0x1b   : > { %s466_s16 = scalar_lea.hbm %s852_s0, 256  ;;  %p467_p4 = scmp.lt.u32.totalorder %s703_s30, %s852_s0 }
  0x1c   : > { %p464_p6 = pnand %p463_p5, %p462_p3  ;;  %p468_p10 = scmp.lt.u32.totalorder %s466_s16, %s461_s7 }
  0x1d   : > { %p470_p12 = scmp.lt.u32.totalorder %s461_s7, %s703_s30 }
  0x1e   : > { %p465_p7 = pneg %p464_p6  ;;  %p469_p13 = por %p468_p10, %p467_p4 }
  0x20   : > { %p471_p1 = por %p470_p12, %p469_p13 }
  0x22   : > { %p472_p2 = pnand %p471_p1, %p465_p7 }
  0x24   : > { %475 = shalt.err (!%p472_p2)
}
  0x25   : > { %s476_s20 = scalar_lea.vmem %s707_s4, 128  ;;  %s609_s28 = smov [#allocation2]  }
  0x26   : > { %p477_p3 = scmp.ne.s32.totalorder %s707_s4, %s476_s20  ;;  %s481_s29 = sshll.u32 %s609_s28, 4  ;;  %s482_s29 = int_to_ptr.vmem [resolvable:$false] %s481_s29 }
  0x27   : > { %s483_s3 = scalar_lea.vmem %s482_s29, 256  ;;  %p484_p9 = scmp.lt.s32.totalorder %s707_s4, %s482_s29 }
  0x28   : > { %p479_p6 = pnand %p477_p3, %p463_p5  ;;  %p485_p4 = scmp.lt.s32.totalorder %s483_s3, %s476_s20 }
  0x2a   : > { %p480_p11 = pneg %p479_p6  ;;  %p486_p10 = por %p485_p4, %p484_p9 }
  0x2c   : > { %p487_p12 = pnand %p486_p10, %p480_p11 }
  0x2e   : > { %490 = shalt.err (!%p487_p12)
}
  0x2f   : > { %396 = dma.hbm_to_vmem [thread:$0]  (!%p711_p0), %s703_s30, 128, %s707_s4, %s134_s6  }
  0x30   : > { %p862_p1 = scmp.lt.s32.totalorder %s607_s14, 3  ;;  %p863_p2 = scmp.ge.s32.totalorder %s607_s14, 1 }
  0x31   : > { %s756_s16 = scalar_lea.hbm %s853_s1, %s371_s27  ;;  %s156_s18 = scalar_lea.vmem [#allocation5], %s370_s26 }
  0x32   : > { %p747_p7 = pnand %p863_p2, %p862_p1  ;;  %s164_s19 = sshll.u32 %s156_s18, 4  ;;  %s165_s19 = int_to_ptr.vmem [resolvable:$true] %s164_s19 }
  0x33   : > { %s153_s30 = scalar_lea.sflag [#allocation6], %s694_s25  ;;  %s491_s4 = scalar_lea.hbm %s756_s16, 128 }
  0x34   : > { %s864_s7 = scalar_select %p747_p7, 1, 0 }
  0x35   : > { %p492_p9 = scmp.ne.s32.totalorder %s756_s16, %s491_s4  ;;  %s496_s27 = scalar_lea.hbm %s853_s1, 256 }
  0x36   : > { %p497_p3 = scmp.lt.u32.totalorder %s756_s16, %s853_s1  ;;  %p498_p6 = scmp.lt.u32.totalorder %s496_s27, %s491_s4 }
  0x37   : > { %p494_p11 = pnand %p492_p9, %p463_p5  ;;  %p500_p10 = scmp.lt.u32.totalorder %s491_s4, %s756_s16 }
  0x38   : > { %p499_p4 = por %p498_p6, %p497_p3 }
  0x39   : > { %p495_p13 = pneg %p494_p11 }
  0x3a   : > { %p501_p12 = por %p500_p10, %p499_p4 }
  0x3c   : > { %p502_p1 = pnand %p501_p12, %p495_p13 }
  0x3e   : > { %505 = shalt.err (!%p502_p1)
}
  0x3f   : > { %s506_s25 = scalar_lea.vmem %s165_s19, 128  ;;  %s610_s26 = smov [#allocation5]  }
  0x40   : > { %p507_p2 = scmp.ne.s32.totalorder %s165_s19, %s506_s25  ;;  %s511_s3 = sshll.u32 %s610_s26, 4  ;;  %s512_s3 = int_to_ptr.vmem [resolvable:$false] %s511_s3 }
  0x41   : > { %s513_s8 = scalar_lea.vmem %s512_s3, 256  ;;  %p514_p8 = scmp.lt.s32.totalorder %s165_s19, %s512_s3 }
  0x42   : > { %p509_p9 = pnand %p507_p2, %p463_p5  ;;  %p515_p7 = scmp.lt.s32.totalorder %s513_s8, %s506_s25 }
  0x44   : > { %p510_p11 = pneg %p509_p9  ;;  %p516_p3 = por %p515_p7, %p514_p8 }
  0x46   : > { %p517_p6 = pnand %p516_p3, %p510_p11 }
  0x48   : > { %520 = shalt.err (!%p517_p6)
}
  0x49   : > { %399 = dma.hbm_to_vmem [thread:$0]  (!%p711_p0), %s756_s16, 128, %s165_s19, %s153_s30  }
  0x4a   : > { %p865_p13 = scmp.ne.s32.totalorder %s864_s7, 0 }
  0x4b   : > { %s783_s15 = sand.u32 (!%p865_p13), 1, %s591_s10   ;;  %p866_p5 = scmp.ne.s32.totalorder (!%p865_p13), %s858_s21, 0 }
  0x4c   : > { %173 = sbr.rel (%p865_p13) target bundleno = 130 (0x82), region = 28  ;;  %s375_s18 = sshll.u32 (!%p865_p13), %s783_s15, 3 }
  0x4d   : > { %s176_s4 = scalar_lea.sflag (!%p865_p13), [#allocation3], %s783_s15  ;;  %s179_s6 = scalar_lea.vmem (!%p865_p13), [#allocation2], %s375_s18 }
  0x53   : > { %574 = dma.done.wait (%p866_p5), %s176_s4, 128  }
  0x54   : > { %576 = vsyncadd (%p866_p5), %s176_s4, 4294967168  ;;  %s185_s5 = scalar_lea.sflag [#allocation6], %s783_s15  ;;  %s188_s16 = scalar_lea.vmem [#allocation5], %s375_s18 }
  0x55   : > { %578 = dma.done.wait (%p866_p5), %s185_s5, 128  }
  0x56   : > { %580 = vsyncadd (%p866_p5), %s185_s5, 4294967168  ;;  %s385_s7 = smul.u32 24, %s783_s15  ;;  %v223_v0 = vld [vmem:[%s179_s6] sm:$0xff]  ;;  %v224_v1 = vld [vmem:[%s188_s16] sm:$0xff]  ;;  %s247_s29 = scalar_lea.sflag [#allocation4], %s783_s15 }
  0x57   : > { %v377_v2 = vmul.f32 -1.442695, %v223_v0  ;;  %s386_s30 = smul.u32 384, %s599_s12  ;;  %p867_p0 = scmp.ne.s32.totalorder %s859_s22, 0 }
  0x58   : > { %s213_s19 = scalar_lea.vmem [#allocation7], %s385_s7  ;;  %s611_s12 = smov [#allocation7]  }
  0x59   : > { %457 = vpow2.f32 %v377_v2  ;;  %381 = vst [vmem:[%s213_s19 + $0x10] sm:$0xff] %v224_v1  ;;  %s260_s20 = sshll.u32 %s213_s19, 4  ;;  %s801_s28 = scalar_lea.hbm %s854_s2, %s386_s30  ;;  %s803_s20 = int_to_ptr.vmem [resolvable:$true] %s260_s20 }
  0x5a   : > { %s521_s25 = scalar_lea.vmem %s803_s20, 384  ;;  %s525_s26 = sshll.u32 %s611_s12, 4  ;;  %s526_s26 = int_to_ptr.vmem [resolvable:$false] %s525_s26 }
  0x5b   : > { %p522_p8 = scmp.ne.s32.totalorder %s803_s20, %s521_s25  ;;  %s527_s3 = scalar_lea.vmem %s526_s26, 768 }
  0x5c   : > { %p528_p10 = scmp.lt.s32.totalorder %s803_s20, %s526_s26  ;;  %p529_p12 = scmp.lt.s32.totalorder %s527_s3, %s521_s25 }
  0x5d   : > { %p523_p7 = pnand %p522_p8, %p867_p0 }
  0x5e   : > { %p530_p1 = por %p529_p12, %p528_p10 }
  0x5f   : > { %p524_p4 = pneg %p523_p7 }
  0x61   : > { %p531_p2 = pnand %p530_p1, %p524_p4 }
  0x63   : > { %v458_v3 = vpop.eup %457 }
  0x64   : > { %v228_v4 = vadd.f32 1.0, %v458_v3 }
  0x66   : > { %459 = vrcp.f32 %v228_v4 }
  0x70   : > { %v460_v5 = vpop.eup %459 }
  0x71   : > { %v232_v6 = vmul.f32 %v460_v5, %v224_v1  ;;  %379 = vst [vmem:[%s213_s19 + $0x8] sm:$0xff] %v460_v5 }
  0x73   : > { %235 = vst [vmem:[%s213_s19] sm:$0xff] %v232_v6 }
  0x74   : > { %534 = shalt.err (!%p531_p2)
}
  0x75   : > { %s535_s8 = scalar_lea.hbm %s801_s28, 384  ;;  %s539_s6 = scalar_lea.hbm %s854_s2, 768 }
  0x76   : > { %p536_p9 = scmp.ne.s32.totalorder %s801_s28, %s535_s8  ;;  %p540_p6 = scmp.lt.u32.totalorder %s801_s28, %s854_s2 }
  0x77   : > { %p541_p13 = scmp.lt.u32.totalorder %s539_s6, %s535_s8  ;;  %p543_p8 = scmp.lt.u32.totalorder %s535_s8, %s801_s28 }
  0x78   : > { %p537_p11 = pnand %p536_p9, %p867_p0 }
  0x79   : > { %p542_p5 = por %p541_p13, %p540_p6 }
  0x7a   : > { %p538_p3 = pneg %p537_p11 }
  0x7b   : > { %p544_p7 = por %p543_p8, %p542_p5 }
  0x7d   : > { %p545_p4 = pnand %p544_p7, %p538_p3 }
  0x7f   : > { %548 = shalt.err (!%p545_p4)
}
  0x80   : > { %s612_s7 = smov 128   ;;  %s613_s19 = smov 8  }
  0x81   : > { %391 = dma.vmem_to_hbm [thread:$0]  (%p867_p0), %s803_s20, 384, %s801_s28, %s247_s29, %s612_s7, %s612_s7, %s613_s19  }
  0x82 PF: > { %s275_s30 = sand.u32 1, %s587_s9   ;;  %p868_p10 = scmp.ne.s32.totalorder %s860_s24, 0 }
  0x83   : > { %p869_p12 = scmp.ge.s32.totalorder %s607_s14, 2  ;;  %s276_s21 = scalar_lea.sflag [#allocation4], %s275_s30 }
  0x85   : > { %p401_p1 = pnand %p869_p12, %p868_p10 }
  0x87   : > { %582 = dma.done.wait (!%p401_p1), %s276_s21, 384  }
  0x88   : > { %584 = vsyncadd (!%p401_p1), %s276_s21, 4294966912  ;;  %s21_s14 = sadd.s32 1, %s607_s14   ;;  %s870_s9 = smov %s591_s10 }
  0x89   : > { %p18_p2 = scmp.ge.s32.totalorder %s21_s14, 4   ;;  %s871_s10 = smov %s595_s11 }
  0x8a   : > { %s872_s11 = smov %s685_s23  ;;  %s873_s12 = smov %s603_s13 }
  0x8b   : > { %s874_s13 = smov %s876_s17  ;;  %20 = sbr.rel (!%p18_p2) target bundleno = 8 (0x8), region = 92 }
  0x92   :  { %281 = vsyncpa [#allocation3], 1 }
  0x93   :  { %283 = vsyncpa [#allocation3 + $0x1], 1 }
  0x94   :  { %284 = vsyncpa [#allocation6], 1 }
  0x95   :  { %286 = vsyncpa [#allocation6 + $0x1], 1 }
  0x96   :  { %287 = vsyncpa [#allocation4], 1 }
  0x97   :  { %289 = vsyncpa [#allocation4 + $0x1], 1 }

</bundles_post_ra>
